<compile_context>
chip_gen: v7x
topology: tpu7x:2x2x1
jax: 0.10.0
libtpu: 0.0.40
codegen_flags: <defaults>
</compile_context>

<pallas_src>
import math

import jax
import jax.numpy as jnp
from jax.experimental import pallas as pl
from jax.experimental.pallas import tpu as pltpu


# ----------------------------------------------------------------------------
# Interpolation-weight construction (glue, plain JAX)
# ----------------------------------------------------------------------------
def bilinear_align_corners_matrix(out_size: int, in_size: int) -> jnp.ndarray:
    """Row-stochastic (out_size, in_size) matrix implementing 1-D bilinear
    interpolation with align_corners=True (matches nn.UpsamplingBilinear2d)."""
    if out_size == 1 or in_size == 1:
        src = jnp.zeros((out_size,), jnp.float32)
    else:
        src = jnp.arange(out_size, dtype=jnp.float32) * (
            (in_size - 1) / (out_size - 1))
    i0 = jnp.clip(jnp.floor(src).astype(jnp.int32), 0, in_size - 1)
    i1 = jnp.clip(i0 + 1, 0, in_size - 1)
    frac = src - i0.astype(jnp.float32)
    oh0 = jax.nn.one_hot(i0, in_size, dtype=jnp.float32)
    oh1 = jax.nn.one_hot(i1, in_size, dtype=jnp.float32)
    return (1.0 - frac)[:, None] * oh0 + frac[:, None] * oh1


def bilinear_kron_matrix_T(out_size: int, hin: int, win: int) -> jnp.ndarray:
    """Transposed 2-D interpolation matrix: (hin*win, out_size*out_size) such
    that out_flat = x_flat @ W2dT implements align_corners bilinear resize."""
    wh = bilinear_align_corners_matrix(out_size, hin)   # (Hout, Hin)
    ww = bilinear_align_corners_matrix(out_size, win)   # (Wout, Win)
    w2d = jnp.kron(wh, ww)                               # (Hout*Wout, Hin*Win)
    return w2d.T                                         # (Hin*Win, Hout*Wout)


# ----------------------------------------------------------------------------
# Pallas kernel: one lane-dense matmul per grid step
# ----------------------------------------------------------------------------
def _resize_matmul_kernel(x_ref, w_ref, o_ref):
    # x_ref: (bc_tile, Hin*Win), w_ref: (Hin*Win, Hout*Wout)
    acc = jnp.dot(x_ref[...].astype(w_ref.dtype), w_ref[...],
                  preferred_element_type=jnp.float32)
    o_ref[...] = acc.astype(o_ref.dtype)


def _pick_bc_tile(bc: int, in_elems: int, out_elems: int) -> int:
    """Pick a row tile over the merged batch*channel axis.

    Sized from a conservative VMEM budget (double-buffered input + output,
    f32 upper bound), capped at 2048 rows, and kept small enough that the
    grid has >= 2 steps (v7x has 2 TensorCores)."""
    if bc <= 8:
        return bc  # full extent — allowed by the (8,128) tiling rule
    vmem_budget = 12 << 20                              # leave headroom on v5e
    row_bytes = 2 * (in_elems + out_elems) * 4          # double-buffered, f32
    cap = max(8, (vmem_budget // row_bytes) // 8 * 8)
    cap = min(cap, 2048)
    half = ((bc + 1) // 2 + 7) // 8 * 8                 # ensure >= 2 grid steps
    return max(8, min(cap, half))


def upsample_bilinear_nchw(x: jnp.ndarray, out_size: int) -> jnp.ndarray:
    """x: (B, C, H, W) -> (B, C, out_size, out_size), align_corners bilinear."""
    B, C, Hin, Win = x.shape
    Hout = Wout = out_size

    if (Hin, Win) == (Hout, Wout):
        # scale factor 1 with align_corners is an exact identity — skip launch.
        return x

    in_elems = Hin * Win
    out_elems = Hout * Wout

    # bf16 inputs feed the MXU natively; everything else upcasts to f32.
    w_dtype = jnp.bfloat16 if x.dtype == jnp.bfloat16 else jnp.float32
    w2dT = bilinear_kron_matrix_T(out_size, Hin, Win).astype(w_dtype)

    BC = B * C
    x_flat = x.reshape(BC, in_elems)

    bc_tile = _pick_bc_tile(BC, in_elems, out_elems)
    grid = pl.cdiv(BC, bc_tile)
    BC_pad = grid * bc_tile
    if BC_pad != BC:
        x_flat = jnp.pad(x_flat, ((0, BC_pad - BC), (0, 0)))

    out = pl.pallas_call(
        _resize_matmul_kernel,
        grid=(grid,),
        in_specs=[
            pl.BlockSpec((bc_tile, in_elems), lambda i: (i, 0)),
            pl.BlockSpec((in_elems, out_elems), lambda i: (0, 0)),
        ],
        out_specs=pl.BlockSpec((bc_tile, out_elems), lambda i: (i, 0)),
        out_shape=jax.ShapeDtypeStruct((BC_pad, out_elems), x.dtype),
        compiler_params=pltpu.CompilerParams(
            dimension_semantics=("parallel",)),
    )(x_flat, w2dT)

    return out[:BC].reshape(B, C, Hout, Wout)


# ----------------------------------------------------------------------------
# Necker forward (matches the PyTorch module; no learnable parameters)
# ----------------------------------------------------------------------------
def necker_forward(tokens, token_sizes):
    target = max(token_sizes)
    align_features = []
    for token, size in zip(tokens, token_sizes):
        if token.ndim == 3:
            B, N, C = token.shape
            s = int(math.isqrt(N - 1))
            assert s == size and s * s == N - 1
            feat = token[:, 1:, :].reshape(B, s, s, C).transpose(0, 3, 1, 2)
        else:
            feat = token  # already NCHW
        align_features.append(upsample_bilinear_nchw(feat, target))
    return align_features


# ----------------------------------------------------------------------------
# Reference (plain JAX) for sanity checking
# ----------------------------------------------------------------------------
def _ref_upsample(x, out_size):
    B, C, Hin, Win = x.shape
    wh = bilinear_align_corners_matrix(out_size, Hin)
    ww = bilinear_align_corners_matrix(out_size, Win)
    return jnp.einsum('oh,bchw,pw->bcop', wh, x.astype(jnp.float32), ww
                      ).astype(x.dtype)


if __name__ == "__main__":
    key = jax.random.PRNGKey(0)
    k0, k1, k2 = jax.random.split(key, 3)

    # synthetic "clip_model.token_size"
    token_sizes = (16, 8, 4)
    B, C = 2, 32

    tokens = [
        # 3-D tokens (with CLS token) for the two larger scales
        jax.random.normal(k0, (B, 16 * 16 + 1, C), dtype=jnp.float32),
        jax.random.normal(k1, (B, 8 * 8 + 1, C), dtype=jnp.float32),
        # 4-D NCHW token for the smallest scale
        jax.random.normal(k2, (B, C, 4, 4), dtype=jnp.float32),
    ]

    outs = necker_forward(tokens, token_sizes)
    outs = [jax.block_until_ready(o) for o in outs]

    # sanity check against a plain-JAX reference of the same math
    ok = True
    target = max(token_sizes)
    for token, size, out in zip(tokens, token_sizes, outs):
        if token.ndim == 3:
            Bt, N, Ct = token.shape
            s = int(math.isqrt(N - 1))
            feat = token[:, 1:, :].reshape(Bt, s, s, Ct).transpose(0, 3, 1, 2)
        else:
            feat = token
        ref = _ref_upsample(feat, target)
        if out.shape != (B, C, target, target):
            ok = False
        if not jnp.allclose(out, ref, atol=1e-5, rtol=1e-5):
            ok = False

    if ok:
        print("KERNEL_OK")
    else:
        print("KERNEL_MISMATCH")
</pallas_src>

<mosaic_0001>
module attributes {stable_mosaic.version = 11 : i64} {
  func.func @_resize_matmul_kernel(%arg0: i32, %arg1: memref<32x64xf32, #tpu.memory_space<vmem>>, %arg2: memref<64x256xf32, #tpu.memory_space<vmem>>, %arg3: memref<32x256xf32, #tpu.memory_space<vmem>>) attributes {dimension_semantics = [#tpu.dimension_semantics<parallel>], iteration_bounds = array<i64: 2>, scalar_prefetch = 0 : i64, scratch_operands = 0 : i64, tpu.core_type = #tpu.core_type<tc>, window_params = [{transform_indices = @transform_0, window_bounds = array<i64: 32, 64>}, {pipeline_mode = #tpu.pipeline_mode<synchronous>, transform_indices = @transform_1, window_bounds = array<i64: 64, 256>}, {transform_indices = @transform_2, window_bounds = array<i64: 32, 256>}]} {
    %c0 = arith.constant 0 : index
    %c0_0 = arith.constant 0 : index
    %0 = vector.load %arg1[%c0, %c0_0] : memref<32x64xf32, #tpu.memory_space<vmem>>, vector<32x64xf32>
    %c0_1 = arith.constant 0 : index
    %c0_2 = arith.constant 0 : index
    %1 = vector.load %arg2[%c0_1, %c0_2] : memref<64x256xf32, #tpu.memory_space<vmem>>, vector<64x256xf32>
    %cst = arith.constant dense<0.000000e+00> : vector<32x256xf32>
    %2 = tpu.matmul %0, %1, %cst {dimension_numbers = #tpu.dot_dimension_numbers<[1], [0], [0], [1], [0, 0, 1, 1], [], []>} : vector<32x64xf32>, vector<64x256xf32>, vector<32x256xf32> -> vector<32x256xf32>
    %c0_3 = arith.constant 0 : index
    %c0_4 = arith.constant 0 : index
    %3 = vector.load %arg3[%c0_3, %c0_4] : memref<32x256xf32, #tpu.memory_space<vmem>>, vector<32x256xf32>
    tpu.vector_store %arg3[%c0_3, %c0_4], %2 {strides = array<i32>} : memref<32x256xf32, #tpu.memory_space<vmem>>, vector<32x256xf32>,
    return
  }
  func.func @transform_0(%arg0: i32) -> (i32, i32) {
    %c0_i32 = arith.constant 0 : i32
    %c0_i32_0 = arith.constant 0 : i32
    return %arg0, %c0_i32 : i32, i32
  }
  func.func @transform_1(%arg0: i32) -> (i32, i32) {
    %c0_i32 = arith.constant 0 : i32
    %c0_i32_0 = arith.constant 0 : i32
    %c0_i32_1 = arith.constant 0 : i32
    return %c0_i32, %c0_i32_0 : i32, i32
  }
  func.func @transform_2(%arg0: i32) -> (i32, i32) {
    %c0_i32 = arith.constant 0 : i32
    %c0_i32_0 = arith.constant 0 : i32
    return %arg0, %c0_i32 : i32, i32
  }
}

</mosaic_0001>

<bundles_post_ra>
// kernel: tpu_custom_call.1
= control target key start
LH: loop header
LB: loop body
LE: loop exit
PB: predicated region body
PF: predicated region fallthrough
CT: control target
= control target key end

     0   :  { %7 = vsyncpa [#allocation3], 0  ;;  %s882_s0 = inlined_call_operand.hbm [shape: f32[64,64], index: 0, kind: input, shape index: {}]   ;;  %s883_s1 = inlined_call_operand.hbm [shape: f32[64,256], index: 1, kind: input, shape index: {}]   ;;  %s884_s2 = inlined_call_operand.hbm [shape: f32[64,256], index: 2, kind: output, shape index: {}]  }
   0x1   :  { %9 = vsyncpa [#allocation3 + $0x1], 0 }
   0x2   :  { %10 = vsyncpa [#allocation6], 0 }
   0x3   :  { %11 = vsyncpa [#allocation4], 0 }
   0x4   :  { %13 = vsyncpa [#allocation4 + $0x1], 0  ;;  %s674_s9 = smov 0   ;;  %s676_s10 = smov 0  }
   0x5   :  { %s678_s11 = smov 0   ;;  %s680_s12 = smov 0  }
   0x6 LB: > { %s695_s13 = sadd.s32 4294967295, %s647_s12   ;;  %s407_s14 = sadd.s32 4294967294, %s647_s12   ;;  %s647_s12 = sphi %s680_s12, %s904_s12   ;;  %s643_s11 = sphi %s678_s11, %s903_s11   ;;  %s639_s10 = sphi %s676_s10, %s902_s10   ;;  %s635_s9 = sphi %s674_s9, %s901_s9  }
   0x7   : > { %p39_p0 = scmp.ne.s32.totalorder %s639_s10, %s635_s9  ;;  %p885_p1 = scmp.eq.s32.totalorder %s695_s13, 0 }
   0x8   : > { %p90_p3 = scmp.eq.s32.totalorder %s407_s14, 1  ;;  %p408_p5 = scmp.ge.s32.totalorder %s647_s12, 1 }
   0x9   : > { %p704_p4 = por %p885_p1, %p39_p0  ;;  %p97_p7 = scmp.lt.s32.totalorder %s647_s12, 3 }
   0xa   : > { %p709_p6 = por %p90_p3, %p39_p0  ;;  %s649_s18 = smov [#allocation5]  }
   0xb   : > { %s888_s15 = scalar_select %p704_p4, 1, 0 }
   0xc   : > { %s889_s16 = scalar_select %p709_p6, 1, 0 }
   0xd   : > { %p714_p8 = pnand %p408_p5, %p97_p7  ;;  %s109_s19 = sshll.u32 %s649_s18, 4  ;;  %s718_s19 = int_to_ptr.vmem [resolvable:$true] %s109_s19 }
   0xe   : > { %s730_s21 = sadd.s32 1, %s647_s12   ;;  %s26_s22 = sadd.s32 1, %s643_s11 }
   0xf   : > { %s890_s17 = scalar_select %p714_p8, 1, 0 }
  0x10   : > { %p463_p9 = pneg %p714_p8  ;;  %s23_s23 = ssub.s32 %s647_s12, %s730_s21 }
  0x11   : > { %s519_s26 = scalar_lea.hbm %s883_s1, 2048 }
  0x12   : > { %p725_p11 = pnand %p463_p9, %p885_p1  ;;  %p520_p12 = scmp.ne.s32.totalorder %s883_s1, %s519_s26 }
  0x13   : > { %p526_p5 = scmp.lt.u32.totalorder %s519_s26, %s883_s1 }
  0x14   : > { %p521_p13 = pneg %p725_p11 }
  0x16   : > { %p522_p0 = pnand %p521_p13, %p520_p12 }
  0x18   : > { %p523_p3 = pneg %p522_p0 }
  0x1a   : > { %p528_p7 = pnand %p526_p5, %p523_p3 }
  0x1c   : > { %531 = shalt.err (!%p528_p7)
}
  0x1d   : > { %s532_s3 = scalar_lea.vmem %s718_s19, 2048  ;;  %p540_p2 = scmp.lt.s32.totalorder %s718_s19, %s718_s19 }
  0x1e   : > { %p533_p9 = scmp.ne.s32.totalorder %s718_s19, %s532_s3  ;;  %p541_p6 = scmp.lt.s32.totalorder %s532_s3, %s532_s3 }
  0x20   : > { %p535_p10 = pnand %p533_p9, %p521_p13  ;;  %p542_p4 = por %p541_p6, %p540_p2 }
  0x22   : > { %p536_p1 = pneg %p535_p10 }
  0x24   : > { %p543_p8 = pnand %p542_p4, %p536_p1 }
  0x26   : > { %546 = shalt.err (!%p543_p8)
}
  0x27   : > { %s650_s4 = smov 256   ;;  %s651_s5 = smov 16  }
  0x28   : > { %466 = dma.hbm_to_vmem [thread:$0]  (!%p725_p11), %s883_s1, 2048, %s718_s19, [#allocation6], %s650_s4, %s650_s4, %s651_s5  }
  0x29   : > { %p24_p2 = scmp.eq.s32.totalorder %s23_s23, 0  ;;  %p33_p1 = scmp.ne.s32.totalorder %s643_s11, %s639_s10 }
  0x2a   : > { %p34_p4 = scmp.eq.s32.totalorder %s647_s12, 0  ;;  %p476_p6 = scmp.lt.s32.totalorder %s647_s12, 2 }
  0x2b   : > { %s761_s8 = scalar_select %p24_p2, %s643_s11, %s26_s22  }
  0x2c   : > { %p35_p8 = por %p34_p4, %p33_p1  ;;  %p892_p10 = scmp.eq.s32.totalorder %s695_s13, 1 }
  0x2d   : > { %s123_s18 = sand.u32 1, %s643_s11   ;;  %s428_s24 = sshll.u32 %s647_s12, 9 }
  0x2e   : > { %p765_p12 = por %p892_p10, %p33_p1  ;;  %s411_s25 = sshll.u32 %s123_s18, 5 }
  0x2f   : > { %s774_s27 = scalar_lea.hbm %s882_s0, %s428_s24  ;;  %s127_s19 = scalar_lea.vmem [#allocation2], %s411_s25 }
  0x30   : > { %s134_s22 = sshll.u32 %s127_s19, 4  ;;  %p776_p11 = pnand %p476_p6, %p35_p8  ;;  %s780_s22 = int_to_ptr.vmem [resolvable:$true] %s134_s22 }
  0x31   : > { %s782_s28 = scalar_lea.sflag [#allocation3], %s123_s18  ;;  %s547_s29 = scalar_lea.hbm %s774_s27, 512 }
  0x32   : > { %p548_p13 = scmp.ne.s32.totalorder %s774_s27, %s547_s29  ;;  %p549_p0 = pneg %p776_p11 }
  0x33   : > { %s552_s4 = scalar_lea.hbm %s882_s0, 1024  ;;  %p553_p7 = scmp.lt.u32.totalorder %s774_s27, %s882_s0 }
  0x34   : > { %p550_p3 = pnand %p549_p0, %p548_p13  ;;  %p554_p9 = scmp.lt.u32.totalorder %s552_s4, %s547_s29 }
  0x35   : > { %p556_p1 = scmp.lt.u32.totalorder %s547_s29, %s774_s27 }
  0x36   : > { %p551_p5 = pneg %p550_p3  ;;  %p555_p2 = por %p554_p9, %p553_p7 }
  0x38   : > { %p557_p4 = por %p556_p1, %p555_p2 }
  0x3a   : > { %p558_p6 = pnand %p557_p4, %p551_p5 }
  0x3c   : > { %561 = shalt.err (!%p558_p6)
}
  0x3d   : > { %s562_s7 = scalar_lea.vmem %s780_s22, 512  ;;  %s652_s18 = smov [#allocation2]  }
  0x3e   : > { %p563_p8 = scmp.ne.s32.totalorder %s780_s22, %s562_s7  ;;  %s567_s24 = sshll.u32 %s652_s18, 4  ;;  %s568_s24 = int_to_ptr.vmem [resolvable:$false] %s567_s24 }
  0x3f   : > { %s569_s25 = scalar_lea.vmem %s568_s24, 1024  ;;  %p570_p3 = scmp.lt.s32.totalorder %s780_s22, %s568_s24 }
  0x40   : > { %p565_p10 = pnand %p563_p8, %p549_p0  ;;  %p571_p7 = scmp.lt.s32.totalorder %s569_s25, %s562_s7 }
  0x42   : > { %p566_p13 = pneg %p565_p10  ;;  %p572_p9 = por %p571_p7, %p570_p3 }
  0x44   : > { %p573_p2 = pnand %p572_p9, %p566_p13 }
  0x46   : > { %576 = shalt.err (!%p573_p2)
}
  0x47   : > { %s653_s20 = smov 128   ;;  %s654_s26 = smov 8  }
  0x48   : > { %470 = dma.hbm_to_vmem [thread:$0]  (!%p776_p11), %s774_s27, 512, %s780_s22, %s782_s28, %s653_s20, %s653_s20, %s654_s26  }
  0x49   : > { %p895_p0 = scmp.ne.s32.totalorder %s890_s17, 0 }
  0x4a   : > { %s813_s19 = sand.u32 (!%p895_p0), 1, %s639_s10   ;;  %p896_p5 = scmp.ne.s32.totalorder (!%p895_p0), %s888_s15, 0 }
  0x4b   : > { %146 = sbr.rel (%p895_p0) target bundleno = 337 (0x151), region = 28  ;;  %s415_s29 = sshll.u32 (!%p895_p0), %s813_s19, 5 }
  0x4c   : > { %s149_s30 = scalar_lea.sflag (!%p895_p0), [#allocation3], %s813_s19  ;;  %s817_s3 = scalar_lea.vmem (!%p895_p0), [#allocation2], %s415_s29 }
  0x52   : > { %622 = dma.done.wait (%p896_p5), %s149_s30, 512  }
  0x53   : > { %624 = vsyncadd (%p896_p5), %s149_s30, 4294966784  ;;  %p897_p11 = scmp.eq.s32.totalorder %s695_s13, 0 }
  0x55   : > { %626 = dma.done.wait (%p897_p11), [#allocation6], 2048   ;;  %p898_p1 = pmov %p897_p11 }
  0x56   : > { %v655_v0 = vmov 0.0   ;;  %v184_v1 = vld [vmem:[#allocation5 + $0x8] sm:$0xff]  ;;  %v186_v2 = vld [vmem:[#allocation5 + $0x18] sm:$0xff]  ;;  %v183_v3 = vld [vmem:[#allocation5] sm:$0xff]  ;;  %vm199_vm0 = vcmask 523264   ;;  %s417_s15 = sshll.u32 %s813_s19, 6 }
  0x57   : > { %628 = vsyncadd (%p898_p1), [#allocation6], 4294965248  ;;  %276 = vmatprep.mubr.f32.mxu0 %v655_v0  ;;  %288 = vmatprep.mubr.f32.mxu1 %v655_v0  ;;  %v431_v4 = vpack.c.bf16 %v186_v2, %v184_v1  ;;  %v185_v5 = vld [vmem:[#allocation5 + $0x10] sm:$0xff]  ;;  %v188_v6 = vld [vmem:[#allocation5 + $0x28] sm:$0xff]  ;;  %s176_s17 = scalar_lea.vmem [#allocation7], %s417_s15  ;;  %s430_s22 = sshll.u32 %s695_s13, 10 }
  0x58   : > { %v190_v7 = vld [vmem:[#allocation5 + $0x38] sm:$0xff]  ;;  %v433_v8 = vpack.c.bf16 %v185_v5, %v183_v3  ;;  %v187_v10 = vld [vmem:[#allocation5 + $0x20] sm:$0xff]  ;;  %v189_v11 = vld [vmem:[#allocation5 + $0x30] sm:$0xff]  ;;  %s324_s27 = sshll.u32 %s176_s17, 4  ;;  %s838_s4 = scalar_lea.hbm %s884_s2, %s430_s22  ;;  %s833_s27 = int_to_ptr.vmem [resolvable:$true] %s324_s27 }
  0x59   : > { %v435_v9 = vpack.c.bf16 %v190_v7, %v188_v6  ;;  %v192_v12 = vld [vmem:[#allocation5 + $0x48] sm:$0xff]  ;;  %432 = vmatprep.subr.bf16.mxu0 %v431_v4  ;;  %447 = vmatprep.subr.bf16.mxu1 %v431_v4  ;;  %v194_v13 = vld [vmem:[#allocation5 + $0x58] sm:$0xff]  ;;  %v437_v14 = vpack.c.bf16 %v189_v11, %v187_v10  ;;  %v191_v16 = vld [vmem:[#allocation5 + $0x40] sm:$0xff]  ;;  %s310_s13 = scalar_lea.sflag [#allocation4], %s813_s19  ;;  %s577_s5 = scalar_lea.vmem %s833_s27, 1024 }
  0x5a   : > { %434 = vmatpush1.bf16.msra.mxu0 %v433_v8  ;;  %451 = vmatpush1.bf16.msra.mxu1 %v433_v8  ;;  %v439_v15 = vpack.c.bf16 %v194_v13, %v192_v12  ;;  %v193_v17 = vld [vmem:[#allocation5 + $0x50] sm:$0xff]  ;;  %v196_v18 = vld [vmem:[#allocation5 + $0x68] sm:$0xff]  ;;  %v198_v19 = vld [vmem:[#allocation5 + $0x78] sm:$0xff]  ;;  %p578_p4 = scmp.ne.s32.totalorder %s833_s27, %s577_s5  ;;  %s656_s6 = smov [#allocation7]  }
  0x5b   : > { %436 = vmatprep.subr.bf16.mxu0 %v435_v9  ;;  %448 = vmatprep.subr.bf16.mxu1 %v435_v9  ;;  %v441_v20 = vpack.c.bf16 %v193_v17, %v191_v16  ;;  %v443_v21 = vpack.c.bf16 %v198_v19, %v196_v18  ;;  %v195_v22 = vld [vmem:[#allocation5 + $0x60] sm:$0xff]  ;;  %v197_v23 = vld [vmem:[#allocation5 + $0x70] sm:$0xff]  ;;  %v180_v27 = vld [vmem:[%s817_s3 + $0x8] sm:$0xff]  ;;  %s581_s7 = sshll.u32 %s656_s6, 4  ;;  %s582_s7 = int_to_ptr.vmem [resolvable:$false] %s581_s7 }
  0x5c   : > { %v445_v24 = vpack.c.bf16 %v197_v23, %v195_v22  ;;  %v179_v25 = vld [vmem:[%s817_s3] sm:$0xff]  ;;  %v181_v26 = vld [vmem:[%s817_s3 + $0x10] sm:$0xff]  ;;  %v182_v28 = vld [vmem:[%s817_s3 + $0x18] sm:$0xff]  ;;  %p579_p6 = pnand %p578_p4, %p765_p12  ;;  %s583_s18 = scalar_lea.vmem %s582_s7, 2048 }
  0x5d   : > { %p584_p10 = scmp.lt.s32.totalorder %s833_s27, %s582_s7  ;;  %p585_p13 = scmp.lt.s32.totalorder %s583_s18, %s577_s5 }
  0x5e   : > { %438 = vmatpush1.bf16.msra.mxu0 %v437_v14  ;;  %452 = vmatpush1.bf16.msra.mxu1 %v437_v14  ;;  %p580_p8 = pneg %p579_p6 }
  0x5f   : > { %440 = vmatprep.subr.bf16.mxu0 %v439_v15  ;;  %449 = vmatprep.subr.bf16.mxu1 %v439_v15  ;;  %p586_p3 = por %p585_p13, %p584_p10 }
  0x61   : > { %p587_p7 = pnand %p586_p3, %p580_p8 }
  0x62   : > { %442 = vmatpush1.bf16.msra.mxu0 %v441_v20  ;;  %453 = vmatpush1.bf16.msra.mxu1 %v441_v20 }
  0x63   : > { %444 = vmatprep.subr.bf16.mxu0 %v443_v21  ;;  %450 = vmatprep.subr.bf16.mxu1 %v443_v21 }
  0x66   : > { %446 = vmatpush1.bf16.msra.mxu0 %v445_v24  ;;  %454 = vmatpush1.bf16.msra.mxu1 %v445_v24 }
  0x69   : > { %418 = vmatmul.mubr.msk.f32.vlgmr.msra.gmra.mrb[0].mxu0 %vm199_vm0, %v179_v25  ;;  %420 = vmatmul.mubr.msk.f32.vlgmr.msra.gmra.mrb[0].mxu1 %vm199_vm0, %v181_v26 }
  0x6a   : > { %282 = vmatprep.mubr.f32.mxu0 %v655_v0  ;;  %294 = vmatprep.mubr.f32.mxu1 %v655_v0 }
  0x6d   : > { %419 = vmatmul.mubr.msk.f32.gmra.mrb[2].mxu0 %vm199_vm0, %v180_v27  ;;  %421 = vmatmul.mubr.msk.f32.gmra.mrb[2].mxu1 %vm199_vm0, %v182_v28 }
 0x13c   : > { %v278_v29 = vpop.f32.mrb[0].mxu0  ;;  %v290_v30 = vpop.f32.mrb[0].mxu1 }
 0x13d   : > { %301 = vst [vmem:[%s176_s17] sm:$0xff] %v278_v29  ;;  %305 = vst [vmem:[%s176_s17 + $0x20] sm:$0xff] %v290_v30  ;;  %v280_v31 = vpop.f32.mrb[1].mxu0  ;;  %v292_v32 = vpop.f32.mrb[1].mxu1 }
 0x13e   : > { %302 = vst [vmem:[%s176_s17 + $0x8] sm:$0xff] %v280_v31  ;;  %306 = vst [vmem:[%s176_s17 + $0x28] sm:$0xff] %v292_v32 }
 0x140   : > { %v284_v33 = vpop.f32.mrb[2].mxu0  ;;  %v296_v34 = vpop.f32.mrb[2].mxu1 }
 0x141   : > { %303 = vst [vmem:[%s176_s17 + $0x10] sm:$0xff] %v284_v33  ;;  %307 = vst [vmem:[%s176_s17 + $0x30] sm:$0xff] %v296_v34  ;;  %v286_v35 = vpop.f32.mrb[3].mxu0  ;;  %v298_v36 = vpop.f32.mrb[3].mxu1 }
 0x142   : > { %304 = vst [vmem:[%s176_s17 + $0x18] sm:$0xff] %v286_v35  ;;  %308 = vst [vmem:[%s176_s17 + $0x38] sm:$0xff] %v298_v36 }
 0x143   : > { %590 = shalt.err (!%p587_p7)
}
 0x144   : > { %s591_s24 = scalar_lea.hbm %s838_s4, 1024  ;;  %s595_s26 = scalar_lea.hbm %s884_s2, 2048 }
 0x145   : > { %p592_p9 = scmp.ne.s32.totalorder %s838_s4, %s591_s24  ;;  %p596_p5 = scmp.lt.u32.totalorder %s838_s4, %s884_s2 }
 0x146   : > { %p597_p11 = scmp.lt.u32.totalorder %s595_s26, %s591_s24  ;;  %p599_p4 = scmp.lt.u32.totalorder %s591_s24, %s838_s4 }
 0x147   : > { %p593_p2 = pnand %p592_p9, %p765_p12 }
 0x148   : > { %p598_p1 = por %p597_p11, %p596_p5 }
 0x149   : > { %p594_p0 = pneg %p593_p2 }
 0x14a   : > { %p600_p6 = por %p599_p4, %p598_p1 }
 0x14c   : > { %p601_p8 = pnand %p600_p6, %p594_p0 }
 0x14e   : > { %604 = shalt.err (!%p601_p8)
}
 0x14f   : > { %s657_s3 = smov 256   ;;  %s658_s15 = smov 16  }
 0x150   : > { %461 = dma.vmem_to_hbm [thread:$0]  (%p765_p12), %s833_s27, 1024, %s838_s4, %s310_s13, %s657_s3, %s657_s3, %s658_s15  }
 0x151 PF: > { %s339_s17 = sand.u32 1, %s635_s9   ;;  %p899_p10 = scmp.ne.s32.totalorder %s889_s16, 0 }
 0x152   : > { %p900_p13 = scmp.ge.s32.totalorder %s647_s12, 2  ;;  %s340_s22 = scalar_lea.sflag [#allocation4], %s339_s17 }
 0x154   : > { %p472_p3 = pnand %p900_p13, %p899_p10 }
 0x156   : > { %630 = dma.done.wait (!%p472_p3), %s340_s22, 1024  }
 0x157   : > { %632 = vsyncadd (!%p472_p3), %s340_s22, 4294966272  ;;  %p16_p7 = scmp.ge.s32.totalorder %s730_s21, 4   ;;  %s901_s9 = smov %s639_s10 }
 0x158   : > { %s902_s10 = smov %s643_s11  ;;  %s903_s11 = smov %s761_s8 }
 0x159   : > { %s904_s12 = smov %s730_s21  ;;  %18 = sbr.rel (!%p16_p7) target bundleno = 6 (0x6), region = 77 }
 0x160   :  { %345 = vsyncpa [#allocation3], 1 }
 0x161   :  { %347 = vsyncpa [#allocation3 + $0x1], 1 }
 0x162   :  { %348 = vsyncpa [#allocation6], 1 }
 0x163   :  { %349 = vsyncpa [#allocation4], 1 }
 0x164   :  { %351 = vsyncpa [#allocation4 + $0x1], 1 }

</bundles_post_ra>
